<compile_context>
chip_gen: v7x
topology: tpu7x:2x2x1
jax: 0.10.0
libtpu: 0.0.40
codegen_flags: <defaults>
</compile_context>

<pallas_src>
import jax
import jax.numpy as jnp
import numpy as np
from jax import lax
from jax.experimental import pallas as pl
from jax.experimental.pallas import tpu as pltpu


def _round_up(x, m):
    return ((x + m - 1) // m) * m


# ----------------------------------------------------------------------------
# Pallas kernel 1: per-mode complex channel mixing
#   out[b, o, m] = sum_i  x[b, i, m] * w[i, o, m]   (complex multiply)
# Grid = (mode_blocks, batch) with batch innermost -> the weight block index is
# constant across consecutive steps, so wr/wi are only re-DMA'd once per mode
# block (not once per batch).  The Cin reduction runs as an in-kernel fori_loop
# accumulating into the VMEM output blocks (no (B, Cin, Cout, M) intermediate).
# ----------------------------------------------------------------------------
def _spectral_mix_kernel(xr_ref, xi_ref, wr_ref, wi_ref, or_ref, oi_ref):
    # xr_ref/xi_ref : (Cin, 1, Mt)      wr_ref/wi_ref : (Cin, Cout, Mt)
    # or_ref/oi_ref : (Cout, Mt)        (accumulated in place, VMEM-resident)
    cin = wr_ref.shape[0]
    or_ref[...] = jnp.zeros_like(or_ref)
    oi_ref[...] = jnp.zeros_like(oi_ref)

    def body(i, carry):
        xr = xr_ref[i]                       # (1, Mt), broadcast over Cout
        xi = xi_ref[i]
        wr = wr_ref[i]                       # (Cout, Mt)
        wi = wi_ref[i]
        or_ref[...] += xr * wr - xi * wi
        oi_ref[...] += xr * wi + xi * wr
        return carry

    lax.fori_loop(0, cin, body, 0, unroll=cin <= 8)


def _spectral_tiles(Mp, Cin, Cout):
    """Pick the mode tile Mt and an explicit VMEM limit from a byte budget."""
    f32 = 4
    cout_p = _round_up(Cout, 8)              # sublane padding of (Cout, Mt) tiles
    # VMEM bytes per unit of Mt:
    #   xr/xi blocks : 2 arrays * 2 buffers * Cin rows (each padded to 8 sublanes)
    #   wr/wi blocks : 2 arrays * 2 buffers * Cin * Cout_pad
    #   out blocks   : 2 arrays * 2 buffers * Cout_pad
    per_mt = f32 * (2 * 2 * Cin * 8 + 2 * 2 * Cin * cout_p + 2 * 2 * cout_p)
    acc_cap = (128 * 1024) // (2 * cout_p * f32)     # accumulators <= ~128 KiB
    vmem_cap = (40 * 1024 * 1024) // per_mt          # total <= ~40 MiB (v7x-safe)
    cap = max(128, min(acc_cap, vmem_cap))
    Mt = 128
    for c in (512, 384, 256, 128):
        if c <= cap and c <= Mp and Mp % c == 0:
            Mt = c
            break
    est = per_mt * Mt
    vmem_limit = int(min(max(2 * est, 32 * 1024 * 1024), 48 * 1024 * 1024))
    return Mt, vmem_limit


def spectral_mix(xr, xi, wr, wi):
    """xr/xi: (B, Cin, Mp), wr/wi: (Cin, Cout, Mp), Mp % 128 == 0."""
    B, Cin, Mp = xr.shape
    Cout = wr.shape[1]
    Mt, vmem_limit = _spectral_tiles(Mp, Cin, Cout)
    grid = (Mp // Mt, B)                     # batch innermost: weights stay resident

    # Leading-Cin layout (Cin on an untiled axis) so the in-kernel fori_loop can
    # index channels dynamically without sublane gathers.
    xr4 = xr.reshape(B, Cin, 1, Mp)
    xi4 = xi.reshape(B, Cin, 1, Mp)

    x_spec = pl.BlockSpec((pl.Squeezed(), Cin, 1, Mt), lambda m, b: (b, 0, 0, m))
    w_spec = pl.BlockSpec((Cin, Cout, Mt), lambda m, b: (0, 0, m))  # const over b
    o_spec = pl.BlockSpec((pl.Squeezed(), Cout, Mt), lambda m, b: (b, 0, m))

    out_shape = (
        jax.ShapeDtypeStruct((B, Cout, Mp), jnp.float32),
        jax.ShapeDtypeStruct((B, Cout, Mp), jnp.float32),
    )
    return pl.pallas_call(
        _spectral_mix_kernel,
        out_shape=out_shape,
        grid=grid,
        in_specs=[x_spec, x_spec, w_spec, w_spec],
        out_specs=(o_spec, o_spec),
        compiler_params=pltpu.CompilerParams(
            dimension_semantics=("parallel", "parallel"),
            vmem_limit_bytes=vmem_limit),
    )(xr4, xi4, wr, wi)


# ----------------------------------------------------------------------------
# Pallas kernel 2: 1x1 conv (channels-first matmul) + bias + residual + SiLU
#   out[b, :, n] = silu( W @ x[b, :, n] + bias + spectral[b, :, n] )
# Lane axis = spatial (H*W) -> unmasked full-width stores; weights/bias are
# VMEM-resident; blocks may cover several batches (Bt > 1) to amortize the
# per-grid-step overhead on the memory-bound path.
# ----------------------------------------------------------------------------
def _pointwise_kernel(x_ref, w_ref, b_ref, spec_ref, o_ref):
    # x_ref: (Bt, Cin, Nt)   w_ref: (Cout, Cin)   b_ref: (Cout, 1)
    # spec_ref/o_ref: (Bt, Cout, Nt)
    bt = x_ref.shape[0]
    w = w_ref[...]
    bias = b_ref[...]

    def body(b, carry):
        y = jnp.dot(w, x_ref[b], preferred_element_type=jnp.float32)  # (Cout, Nt)
        z = y + bias + spec_ref[b]
        o_ref[b] = (z * jax.nn.sigmoid(z)).astype(o_ref.dtype)        # SiLU / swish
        return carry

    lax.fori_loop(0, bt, body, 0, unroll=bt <= 4)


def _pointwise_tiles(B, Cin, Cout, Np):
    f32 = 4
    cin_p = _round_up(Cin, 8)
    cout_p = _round_up(Cout, 8)
    per_bn = f32 * 2 * (cin_p + 2 * cout_p)          # per (batch, lane), dbl-buffered
    budget = 24 * 1024 * 1024
    Nt = 128
    for c in (4096, 2048, 1024, 512, 256, 128):      # big tiles amortize step cost
        if c <= Np and Np % c == 0 and per_bn * c <= budget:
            Nt = c
            break
    n_steps = Np // Nt
    Bt = 1
    for cand in range(B, 0, -1):                     # cover several batches per block
        if B % cand:
            continue
        if per_bn * Nt * cand > budget:
            continue
        if cand > 1 and (B // cand) * n_steps < 2 and B * n_steps >= 2:
            continue                                 # keep >= 2 steps for megacore
        Bt = cand
        break
    est = per_bn * Nt * Bt + f32 * 2 * (cout_p * Cin + cout_p)
    vmem_limit = int(min(max(2 * est, 32 * 1024 * 1024), 48 * 1024 * 1024))
    return Bt, Nt, vmem_limit


def pointwise_add_act(x3, w_mat, b_col, spec3):
    """x3: (B, Cin, Np), spec3: (B, Cout, Np), Np % 128 == 0."""
    B, Cin, Np = x3.shape
    Cout = w_mat.shape[0]
    Bt, Nt, vmem_limit = _pointwise_tiles(B, Cin, Cout, Np)
    grid = (B // Bt, Np // Nt)

    return pl.pallas_call(
        _pointwise_kernel,
        out_shape=jax.ShapeDtypeStruct((B, Cout, Np), jnp.float32),
        grid=grid,
        in_specs=[
            pl.BlockSpec((Bt, Cin, Nt), lambda b, n: (b, 0, n)),
            pl.BlockSpec((Cout, Cin), lambda b, n: (0, 0)),   # weights resident
            pl.BlockSpec((Cout, 1), lambda b, n: (0, 0)),     # bias resident
            pl.BlockSpec((Bt, Cout, Nt), lambda b, n: (b, 0, n)),
        ],
        out_specs=pl.BlockSpec((Bt, Cout, Nt), lambda b, n: (b, 0, n)),
        compiler_params=pltpu.CompilerParams(
            dimension_semantics=("parallel", "parallel"),
            vmem_limit_bytes=vmem_limit),
    )(x3, w_mat, b_col, spec3)


# ----------------------------------------------------------------------------
# One-time weight prep (hoisted out of the per-call forward)
# ----------------------------------------------------------------------------
def prepare_fno_block_params(spectral_w, conv_w, conv_b, modes_x, modes_y, H, W):
    Cin, Cout = spectral_w.shape[0], spectral_w.shape[1]
    Wf = W // 2 + 1
    x_limit = min(modes_x, H)
    y_limit = min(modes_y, Wf)
    M = x_limit * y_limit
    Mp = _round_up(M, 128)                   # pad lane axis (zeros are inert)
    wr = spectral_w[:, :, :x_limit, :y_limit, 0].reshape(Cin, Cout, M)
    wi = spectral_w[:, :, :x_limit, :y_limit, 1].reshape(Cin, Cout, M)
    if Mp != M:
        pad = ((0, 0), (0, 0), (0, Mp - M))
        wr = jnp.pad(wr, pad)
        wi = jnp.pad(wi, pad)
    return {
        "wr": jnp.asarray(wr, jnp.float32),
        "wi": jnp.asarray(wi, jnp.float32),
        "w_mat": conv_w.reshape(Cout, Cin).astype(jnp.float32),
        "b_col": conv_b.reshape(Cout, 1).astype(jnp.float32),
        "x_limit": x_limit,
        "y_limit": y_limit,
        "M": M,
        "Mp": Mp,
    }


# ----------------------------------------------------------------------------
# FNOBlock forward (glue in plain JAX, hot paths in Pallas)
# ----------------------------------------------------------------------------
def fno_block_forward(x, params):
    B, Cin, H, W = x.shape
    wr, wi = params["wr"], params["wi"]
    Cout = wr.shape[1]
    x_limit, y_limit = params["x_limit"], params["y_limit"]
    M, Mp = params["M"], params["Mp"]

    # --- SpectralConv2d ---
    # TODO(synk): rfft2/irfft2 have no Pallas TPU primitive; they stay in jnp.fft.
    x_ft = jnp.fft.rfft2(x.astype(jnp.float32), norm="ortho")     # (B, Cin, H, Wf)
    Wf = x_ft.shape[-1]

    xs = x_ft[:, :, :x_limit, :y_limit]
    xr = jnp.real(xs).reshape(B, Cin, M)
    xi = jnp.imag(xs).reshape(B, Cin, M)
    if Mp != M:
        pad = ((0, 0), (0, 0), (0, Mp - M))
        xr = jnp.pad(xr, pad)
        xi = jnp.pad(xi, pad)

    out_r, out_i = spectral_mix(xr, xi, wr, wi)                    # (B, Cout, Mp)
    out_r = out_r[:, :, :M].reshape(B, Cout, x_limit, y_limit)
    out_i = out_i[:, :, :M].reshape(B, Cout, x_limit, y_limit)
    out_slice = (out_r + 1j * out_i).astype(jnp.complex64)

    # TODO(synk): zero-padded spectrum scatter stays in XLA (tiny vs. the FFTs).
    out_ft = jnp.zeros((B, Cout, H, Wf), dtype=jnp.complex64)
    out_ft = out_ft.at[:, :, :x_limit, :y_limit].set(out_slice)
    out_spectral = jnp.fft.irfft2(out_ft, s=(H, W), norm="ortho")  # (B, Cout, H, W)

    # --- 1x1 conv + bias + residual + SiLU (fused, channels-first, no transposes) ---
    HW = H * W
    HWp = _round_up(HW, 128)
    x3 = x.astype(jnp.float32).reshape(B, Cin, HW)
    spec3 = out_spectral.reshape(B, Cout, HW)
    if HWp != HW:
        # TODO(synk): ragged spatial tails could use a masked final block instead
        # of this extra pad pass; production grids keep H*W % 128 == 0.
        x3 = jnp.pad(x3, ((0, 0), (0, 0), (0, HWp - HW)))
        spec3 = jnp.pad(spec3, ((0, 0), (0, 0), (0, HWp - HW)))

    out3 = pointwise_add_act(x3, params["w_mat"], params["b_col"], spec3)
    return out3[:, :, :HW].reshape(B, Cout, H, W)


# ----------------------------------------------------------------------------
# Pure-JAX reference (mirrors the PyTorch forward exactly), for verification
# ----------------------------------------------------------------------------
def fno_block_reference(x, spectral_w, conv_w, conv_b, modes_x, modes_y):
    B, Cin, H, W = x.shape
    Cout = spectral_w.shape[1]
    x_ft = jnp.fft.rfft2(x.astype(jnp.float32), norm="ortho")
    Wf = x_ft.shape[-1]
    x_limit = min(modes_x, H)
    y_limit = min(modes_y, Wf)
    xs = x_ft[:, :, :x_limit, :y_limit]                            # (B, Cin, mx, my)
    w_c = (spectral_w[:, :, :x_limit, :y_limit, 0]
           + 1j * spectral_w[:, :, :x_limit, :y_limit, 1])
    out_slice = jnp.einsum("bixy,ioxy->boxy", xs, w_c)
    out_ft = jnp.zeros((B, Cout, H, Wf), dtype=jnp.complex64)
    out_ft = out_ft.at[:, :, :x_limit, :y_limit].set(out_slice)
    out_spectral = jnp.fft.irfft2(out_ft, s=(H, W), norm="ortho")
    out_linear = jnp.einsum("bihw,oi->bohw", x.astype(jnp.float32),
                            conv_w.reshape(Cout, Cin)) + conv_b[None, :, None, None]
    z = out_spectral + out_linear
    return z * jax.nn.sigmoid(z)


if __name__ == "__main__":
    # Small shapes consistent with the module's forward.
    B, Cin, Cout, H, W = 2, 4, 4, 16, 16
    modes_x, modes_y = 8, 8

    key = jax.random.PRNGKey(0)
    kx, kw, kc, kb = jax.random.split(key, 4)

    x = jax.random.normal(kx, (B, Cin, H, W), dtype=jnp.float32)
    # SpectralConv2d: weights = randn(in, out, mx, my, 2) * 0.02
    spectral_w = 0.02 * jax.random.normal(
        kw, (Cin, Cout, modes_x, modes_y, 2), dtype=jnp.float32)
    # nn.Conv2d(in, out, kernel_size=1): weight (out, in, 1, 1), bias (out,)
    conv_w = 0.1 * jax.random.normal(kc, (Cout, Cin, 1, 1), dtype=jnp.float32)
    conv_b = 0.1 * jax.random.normal(kb, (Cout,), dtype=jnp.float32)

    # Weight prep is hoisted out of the forward (done once, reused per call).
    params = prepare_fno_block_params(spectral_w, conv_w, conv_b,
                                      modes_x, modes_y, H, W)

    out = fno_block_forward(x, params)
    out = jax.block_until_ready(out)

    ref = jax.block_until_ready(
        fno_block_reference(x, spectral_w, conv_w, conv_b, modes_x, modes_y))
    np.testing.assert_allclose(np.asarray(out), np.asarray(ref), rtol=1e-5, atol=1e-5)

    print("KERNEL_OK")
</pallas_src>

<mosaic_0001>
module attributes {stable_mosaic.version = 11 : i64} {
  func.func @_spectral_mix_kernel(%arg0: i32, %arg1: i32, %arg2: memref<1x4x1x128xf32, #tpu.memory_space<vmem>>, %arg3: memref<1x4x1x128xf32, #tpu.memory_space<vmem>>, %arg4: memref<4x4x128xf32, #tpu.memory_space<vmem>>, %arg5: memref<4x4x128xf32, #tpu.memory_space<vmem>>, %arg6: memref<1x4x128xf32, #tpu.memory_space<vmem>>, %arg7: memref<1x4x128xf32, #tpu.memory_space<vmem>>) attributes {dimension_semantics = [#tpu.dimension_semantics<parallel>, #tpu.dimension_semantics<parallel>], iteration_bounds = array<i64: 1, 2>, scalar_prefetch = 0 : i64, scratch_operands = 0 : i64, tpu.core_type = #tpu.core_type<tc>, window_params = [{transform_indices = @transform_0, window_bounds = array<i64: 1, 4, 1, 128>}, {transform_indices = @transform_1, window_bounds = array<i64: 1, 4, 1, 128>}, {transform_indices = @transform_2, window_bounds = array<i64: 4, 4, 128>}, {transform_indices = @transform_3, window_bounds = array<i64: 4, 4, 128>}, {transform_indices = @transform_4, window_bounds = array<i64: 1, 4, 128>}, {transform_indices = @transform_5, window_bounds = array<i64: 1, 4, 128>}]} {
    %cst = arith.constant 0.000000e+00 : f32
    %0 = vector.broadcast %cst : f32 to vector<4x128xf32>
    %c0 = arith.constant 0 : index
    %c0_0 = arith.constant 0 : index
    %c0_1 = arith.constant 0 : index
    %1 = vector.load %arg6[%c0, %c0_0, %c0_1] : memref<1x4x128xf32, #tpu.memory_space<vmem>>, vector<1x4x128xf32>
    %2 = vector.shape_cast %1 : vector<1x4x128xf32> to vector<4x128xf32>
    %3 = vector.shape_cast %0 : vector<4x128xf32> to vector<1x4x128xf32>
    tpu.vector_store %arg6[%c0, %c0_0, %c0_1], %3 {strides = array<i32>} : memref<1x4x128xf32, #tpu.memory_space<vmem>>, vector<1x4x128xf32>,
    %cst_2 = arith.constant 0.000000e+00 : f32
    %4 = vector.broadcast %cst_2 : f32 to vector<4x128xf32>
    %c0_3 = arith.constant 0 : index
    %c0_4 = arith.constant 0 : index
    %c0_5 = arith.constant 0 : index
    %5 = vector.load %arg7[%c0_3, %c0_4, %c0_5] : memref<1x4x128xf32, #tpu.memory_space<vmem>>, vector<1x4x128xf32>
    %6 = vector.shape_cast %5 : vector<1x4x128xf32> to vector<4x128xf32>
    %7 = vector.shape_cast %4 : vector<4x128xf32> to vector<1x4x128xf32>
    tpu.vector_store %arg7[%c0_3, %c0_4, %c0_5], %7 {strides = array<i32>} : memref<1x4x128xf32, #tpu.memory_space<vmem>>, vector<1x4x128xf32>,
    %c0_i32 = arith.constant 0 : i32
    %c0_6 = arith.constant 0 : index
    %8 = arith.index_cast %c0_i32 : i32 to index
    %c0_7 = arith.constant 0 : index
    %c0_8 = arith.constant 0 : index
    %9 = vector.load %arg2[%c0_6, %8, %c0_7, %c0_8] : memref<1x4x1x128xf32, #tpu.memory_space<vmem>>, vector<1x1x1x128xf32>
    %10 = vector.shape_cast %9 : vector<1x1x1x128xf32> to vector<1x128xf32>
    %c0_9 = arith.constant 0 : index
    %11 = arith.index_cast %c0_i32 : i32 to index
    %c0_10 = arith.constant 0 : index
    %c0_11 = arith.constant 0 : index
    %12 = vector.load %arg3[%c0_9, %11, %c0_10, %c0_11] : memref<1x4x1x128xf32, #tpu.memory_space<vmem>>, vector<1x1x1x128xf32>
    %13 = vector.shape_cast %12 : vector<1x1x1x128xf32> to vector<1x128xf32>
    %14 = arith.index_cast %c0_i32 : i32 to index
    %c0_12 = arith.constant 0 : index
    %c0_13 = arith.constant 0 : index
    %15 = vector.load %arg4[%14, %c0_12, %c0_13] : memref<4x4x128xf32, #tpu.memory_space<vmem>>, vector<1x4x128xf32>
    %16 = vector.shape_cast %15 : vector<1x4x128xf32> to vector<4x128xf32>
    %17 = arith.index_cast %c0_i32 : i32 to index
    %c0_14 = arith.constant 0 : index
    %c0_15 = arith.constant 0 : index
    %18 = vector.load %arg5[%17, %c0_14, %c0_15] : memref<4x4x128xf32, #tpu.memory_space<vmem>>, vector<1x4x128xf32>
    %19 = vector.shape_cast %18 : vector<1x4x128xf32> to vector<4x128xf32>
    %c0_16 = arith.constant 0 : index
    %c0_17 = arith.constant 0 : index
    %c0_18 = arith.constant 0 : index
    %20 = vector.load %arg6[%c0_16, %c0_17, %c0_18] : memref<1x4x128xf32, #tpu.memory_space<vmem>>, vector<1x4x128xf32>
    %21 = vector.shape_cast %20 : vector<1x4x128xf32> to vector<4x128xf32>
    %22 = vector.broadcast %10 : vector<1x128xf32> to vector<4x128xf32>
    %23 = arith.mulf %22, %16 : vector<4x128xf32>
    %24 = vector.broadcast %13 : vector<1x128xf32> to vector<4x128xf32>
    %25 = arith.mulf %24, %19 : vector<4x128xf32>
    %26 = arith.subf %23, %25 : vector<4x128xf32>
    %27 = arith.addf %21, %26 : vector<4x128xf32>
    %c0_19 = arith.constant 0 : index
    %c0_20 = arith.constant 0 : index
    %c0_21 = arith.constant 0 : index
    %28 = vector.load %arg6[%c0_19, %c0_20, %c0_21] : memref<1x4x128xf32, #tpu.memory_space<vmem>>, vector<1x4x128xf32>
    %29 = vector.shape_cast %28 : vector<1x4x128xf32> to vector<4x128xf32>
    %30 = vector.shape_cast %27 : vector<4x128xf32> to vector<1x4x128xf32>
    tpu.vector_store %arg6[%c0_19, %c0_20, %c0_21], %30 {strides = array<i32>} : memref<1x4x128xf32, #tpu.memory_space<vmem>>, vector<1x4x128xf32>,
    %c0_22 = arith.constant 0 : index
    %c0_23 = arith.constant 0 : index
    %c0_24 = arith.constant 0 : index
    %31 = vector.load %arg7[%c0_22, %c0_23, %c0_24] : memref<1x4x128xf32, #tpu.memory_space<vmem>>, vector<1x4x128xf32>
    %32 = vector.shape_cast %31 : vector<1x4x128xf32> to vector<4x128xf32>
    %33 = vector.broadcast %10 : vector<1x128xf32> to vector<4x128xf32>
    %34 = arith.mulf %33, %19 : vector<4x128xf32>
    %35 = vector.broadcast %13 : vector<1x128xf32> to vector<4x128xf32>
    %36 = arith.mulf %35, %16 : vector<4x128xf32>
    %37 = arith.addf %34, %36 : vector<4x128xf32>
    %38 = arith.addf %32, %37 : vector<4x128xf32>
    %c0_25 = arith.constant 0 : index
    %c0_26 = arith.constant 0 : index
    %c0_27 = arith.constant 0 : index
    %39 = vector.load %arg7[%c0_25, %c0_26, %c0_27] : memref<1x4x128xf32, #tpu.memory_space<vmem>>, vector<1x4x128xf32>
    %40 = vector.shape_cast %39 : vector<1x4x128xf32> to vector<4x128xf32>
    %41 = vector.shape_cast %38 : vector<4x128xf32> to vector<1x4x128xf32>
    tpu.vector_store %arg7[%c0_25, %c0_26, %c0_27], %41 {strides = array<i32>} : memref<1x4x128xf32, #tpu.memory_space<vmem>>, vector<1x4x128xf32>,
    %c1_i32 = arith.constant 1 : i32
    %c0_28 = arith.constant 0 : index
    %42 = arith.index_cast %c1_i32 : i32 to index
    %c0_29 = arith.constant 0 : index
    %c0_30 = arith.constant 0 : index
    %43 = vector.load %arg2[%c0_28, %42, %c0_29, %c0_30] : memref<1x4x1x128xf32, #tpu.memory_space<vmem>>, vector<1x1x1x128xf32>
    %44 = vector.shape_cast %43 : vector<1x1x1x128xf32> to vector<1x128xf32>
    %c0_31 = arith.constant 0 : index
    %45 = arith.index_cast %c1_i32 : i32 to index
    %c0_32 = arith.constant 0 : index
    %c0_33 = arith.constant 0 : index
    %46 = vector.load %arg3[%c0_31, %45, %c0_32, %c0_33] : memref<1x4x1x128xf32, #tpu.memory_space<vmem>>, vector<1x1x1x128xf32>
    %47 = vector.shape_cast %46 : vector<1x1x1x128xf32> to vector<1x128xf32>
    %48 = arith.index_cast %c1_i32 : i32 to index
    %c0_34 = arith.constant 0 : index
    %c0_35 = arith.constant 0 : index
    %49 = vector.load %arg4[%48, %c0_34, %c0_35] : memref<4x4x128xf32, #tpu.memory_space<vmem>>, vector<1x4x128xf32>
    %50 = vector.shape_cast %49 : vector<1x4x128xf32> to vector<4x128xf32>
    %51 = arith.index_cast %c1_i32 : i32 to index
    %c0_36 = arith.constant 0 : index
    %c0_37 = arith.constant 0 : index
    %52 = vector.load %arg5[%51, %c0_36, %c0_37] : memref<4x4x128xf32, #tpu.memory_space<vmem>>, vector<1x4x128xf32>
    %53 = vector.shape_cast %52 : vector<1x4x128xf32> to vector<4x128xf32>
    %c0_38 = arith.constant 0 : index
    %c0_39 = arith.constant 0 : index
    %c0_40 = arith.constant 0 : index
    %54 = vector.load %arg6[%c0_38, %c0_39, %c0_40] : memref<1x4x128xf32, #tpu.memory_space<vmem>>, vector<1x4x128xf32>
    %55 = vector.shape_cast %54 : vector<1x4x128xf32> to vector<4x128xf32>
    %56 = vector.broadcast %44 : vector<1x128xf32> to vector<4x128xf32>
    %57 = arith.mulf %56, %50 : vector<4x128xf32>
    %58 = vector.broadcast %47 : vector<1x128xf32> to vector<4x128xf32>
    %59 = arith.mulf %58, %53 : vector<4x128xf32>
    %60 = arith.subf %57, %59 : vector<4x128xf32>
    %61 = arith.addf %55, %60 : vector<4x128xf32>
    %c0_41 = arith.constant 0 : index
    %c0_42 = arith.constant 0 : index
    %c0_43 = arith.constant 0 : index
    %62 = vector.load %arg6[%c0_41, %c0_42, %c0_43] : memref<1x4x128xf32, #tpu.memory_space<vmem>>, vector<1x4x128xf32>
    %63 = vector.shape_cast %62 : vector<1x4x128xf32> to vector<4x128xf32>
    %64 = vector.shape_cast %61 : vector<4x128xf32> to vector<1x4x128xf32>
    tpu.vector_store %arg6[%c0_41, %c0_42, %c0_43], %64 {strides = array<i32>} : memref<1x4x128xf32, #tpu.memory_space<vmem>>, vector<1x4x128xf32>,
    %c0_44 = arith.constant 0 : index
    %c0_45 = arith.constant 0 : index
    %c0_46 = arith.constant 0 : index
    %65 = vector.load %arg7[%c0_44, %c0_45, %c0_46] : memref<1x4x128xf32, #tpu.memory_space<vmem>>, vector<1x4x128xf32>
    %66 = vector.shape_cast %65 : vector<1x4x128xf32> to vector<4x128xf32>
    %67 = vector.broadcast %44 : vector<1x128xf32> to vector<4x128xf32>
    %68 = arith.mulf %67, %53 : vector<4x128xf32>
    %69 = vector.broadcast %47 : vector<1x128xf32> to vector<4x128xf32>
    %70 = arith.mulf %69, %50 : vector<4x128xf32>
    %71 = arith.addf %68, %70 : vector<4x128xf32>
    %72 = arith.addf %66, %71 : vector<4x128xf32>
    %c0_47 = arith.constant 0 : index
    %c0_48 = arith.constant 0 : index
    %c0_49 = arith.constant 0 : index
    %73 = vector.load %arg7[%c0_47, %c0_48, %c0_49] : memref<1x4x128xf32, #tpu.memory_space<vmem>>, vector<1x4x128xf32>
    %74 = vector.shape_cast %73 : vector<1x4x128xf32> to vector<4x128xf32>
    %75 = vector.shape_cast %72 : vector<4x128xf32> to vector<1x4x128xf32>
    tpu.vector_store %arg7[%c0_47, %c0_48, %c0_49], %75 {strides = array<i32>} : memref<1x4x128xf32, #tpu.memory_space<vmem>>, vector<1x4x128xf32>,
    %c2_i32 = arith.constant 2 : i32
    %c0_50 = arith.constant 0 : index
    %76 = arith.index_cast %c2_i32 : i32 to index
    %c0_51 = arith.constant 0 : index
    %c0_52 = arith.constant 0 : index
    %77 = vector.load %arg2[%c0_50, %76, %c0_51, %c0_52] : memref<1x4x1x128xf32, #tpu.memory_space<vmem>>, vector<1x1x1x128xf32>
    %78 = vector.shape_cast %77 : vector<1x1x1x128xf32> to vector<1x128xf32>
    %c0_53 = arith.constant 0 : index
    %79 = arith.index_cast %c2_i32 : i32 to index
    %c0_54 = arith.constant 0 : index
    %c0_55 = arith.constant 0 : index
    %80 = vector.load %arg3[%c0_53, %79, %c0_54, %c0_55] : memref<1x4x1x128xf32, #tpu.memory_space<vmem>>, vector<1x1x1x128xf32>
    %81 = vector.shape_cast %80 : vector<1x1x1x128xf32> to vector<1x128xf32>
    %82 = arith.index_cast %c2_i32 : i32 to index
    %c0_56 = arith.constant 0 : index
    %c0_57 = arith.constant 0 : index
    %83 = vector.load %arg4[%82, %c0_56, %c0_57] : memref<4x4x128xf32, #tpu.memory_space<vmem>>, vector<1x4x128xf32>
    %84 = vector.shape_cast %83 : vector<1x4x128xf32> to vector<4x128xf32>
    %85 = arith.index_cast %c2_i32 : i32 to index
    %c0_58 = arith.constant 0 : index
    %c0_59 = arith.constant 0 : index
    %86 = vector.load %arg5[%85, %c0_58, %c0_59] : memref<4x4x128xf32, #tpu.memory_space<vmem>>, vector<1x4x128xf32>
    %87 = vector.shape_cast %86 : vector<1x4x128xf32> to vector<4x128xf32>
    %c0_60 = arith.constant 0 : index
    %c0_61 = arith.constant 0 : index
    %c0_62 = arith.constant 0 : index
    %88 = vector.load %arg6[%c0_60, %c0_61, %c0_62] : memref<1x4x128xf32, #tpu.memory_space<vmem>>, vector<1x4x128xf32>
    %89 = vector.shape_cast %88 : vector<1x4x128xf32> to vector<4x128xf32>
    %90 = vector.broadcast %78 : vector<1x128xf32> to vector<4x128xf32>
    %91 = arith.mulf %90, %84 : vector<4x128xf32>
    %92 = vector.broadcast %81 : vector<1x128xf32> to vector<4x128xf32>
    %93 = arith.mulf %92, %87 : vector<4x128xf32>
    %94 = arith.subf %91, %93 : vector<4x128xf32>
    %95 = arith.addf %89, %94 : vector<4x128xf32>
    %c0_63 = arith.constant 0 : index
    %c0_64 = arith.constant 0 : index
    %c0_65 = arith.constant 0 : index
    %96 = vector.load %arg6[%c0_63, %c0_64, %c0_65] : memref<1x4x128xf32, #tpu.memory_space<vmem>>, vector<1x4x128xf32>
    %97 = vector.shape_cast %96 : vector<1x4x128xf32> to vector<4x128xf32>
    %98 = vector.shape_cast %95 : vector<4x128xf32> to vector<1x4x128xf32>
    tpu.vector_store %arg6[%c0_63, %c0_64, %c0_65], %98 {strides = array<i32>} : memref<1x4x128xf32, #tpu.memory_space<vmem>>, vector<1x4x128xf32>,
    %c0_66 = arith.constant 0 : index
    %c0_67 = arith.constant 0 : index
    %c0_68 = arith.constant 0 : index
    %99 = vector.load %arg7[%c0_66, %c0_67, %c0_68] : memref<1x4x128xf32, #tpu.memory_space<vmem>>, vector<1x4x128xf32>
    %100 = vector.shape_cast %99 : vector<1x4x128xf32> to vector<4x128xf32>
    %101 = vector.broadcast %78 : vector<1x128xf32> to vector<4x128xf32>
    %102 = arith.mulf %101, %87 : vector<4x128xf32>
    %103 = vector.broadcast %81 : vector<1x128xf32> to vector<4x128xf32>
    %104 = arith.mulf %103, %84 : vector<4x128xf32>
    %105 = arith.addf %102, %104 : vector<4x128xf32>
    %106 = arith.addf %100, %105 : vector<4x128xf32>
    %c0_69 = arith.constant 0 : index
    %c0_70 = arith.constant 0 : index
    %c0_71 = arith.constant 0 : index
    %107 = vector.load %arg7[%c0_69, %c0_70, %c0_71] : memref<1x4x128xf32, #tpu.memory_space<vmem>>, vector<1x4x128xf32>
    %108 = vector.shape_cast %107 : vector<1x4x128xf32> to vector<4x128xf32>
    %109 = vector.shape_cast %106 : vector<4x128xf32> to vector<1x4x128xf32>
    tpu.vector_store %arg7[%c0_69, %c0_70, %c0_71], %109 {strides = array<i32>} : memref<1x4x128xf32, #tpu.memory_space<vmem>>, vector<1x4x128xf32>,
    %c3_i32 = arith.constant 3 : i32
    %c0_72 = arith.constant 0 : index
    %110 = arith.index_cast %c3_i32 : i32 to index
    %c0_73 = arith.constant 0 : index
    %c0_74 = arith.constant 0 : index
    %111 = vector.load %arg2[%c0_72, %110, %c0_73, %c0_74] : memref<1x4x1x128xf32, #tpu.memory_space<vmem>>, vector<1x1x1x128xf32>
    %112 = vector.shape_cast %111 : vector<1x1x1x128xf32> to vector<1x128xf32>
    %c0_75 = arith.constant 0 : index
    %113 = arith.index_cast %c3_i32 : i32 to index
    %c0_76 = arith.constant 0 : index
    %c0_77 = arith.constant 0 : index
    %114 = vector.load %arg3[%c0_75, %113, %c0_76, %c0_77] : memref<1x4x1x128xf32, #tpu.memory_space<vmem>>, vector<1x1x1x128xf32>
    %115 = vector.shape_cast %114 : vector<1x1x1x128xf32> to vector<1x128xf32>
    %116 = arith.index_cast %c3_i32 : i32 to index
    %c0_78 = arith.constant 0 : index
    %c0_79 = arith.constant 0 : index
    %117 = vector.load %arg4[%116, %c0_78, %c0_79] : memref<4x4x128xf32, #tpu.memory_space<vmem>>, vector<1x4x128xf32>
    %118 = vector.shape_cast %117 : vector<1x4x128xf32> to vector<4x128xf32>
    %119 = arith.index_cast %c3_i32 : i32 to index
    %c0_80 = arith.constant 0 : index
    %c0_81 = arith.constant 0 : index
    %120 = vector.load %arg5[%119, %c0_80, %c0_81] : memref<4x4x128xf32, #tpu.memory_space<vmem>>, vector<1x4x128xf32>
    %121 = vector.shape_cast %120 : vector<1x4x128xf32> to vector<4x128xf32>
    %c0_82 = arith.constant 0 : index
    %c0_83 = arith.constant 0 : index
    %c0_84 = arith.constant 0 : index
    %122 = vector.load %arg6[%c0_82, %c0_83, %c0_84] : memref<1x4x128xf32, #tpu.memory_space<vmem>>, vector<1x4x128xf32>
    %123 = vector.shape_cast %122 : vector<1x4x128xf32> to vector<4x128xf32>
    %124 = vector.broadcast %112 : vector<1x128xf32> to vector<4x128xf32>
    %125 = arith.mulf %124, %118 : vector<4x128xf32>
    %126 = vector.broadcast %115 : vector<1x128xf32> to vector<4x128xf32>
    %127 = arith.mulf %126, %121 : vector<4x128xf32>
    %128 = arith.subf %125, %127 : vector<4x128xf32>
    %129 = arith.addf %123, %128 : vector<4x128xf32>
    %c0_85 = arith.constant 0 : index
    %c0_86 = arith.constant 0 : index
    %c0_87 = arith.constant 0 : index
    %130 = vector.load %arg6[%c0_85, %c0_86, %c0_87] : memref<1x4x128xf32, #tpu.memory_space<vmem>>, vector<1x4x128xf32>
    %131 = vector.shape_cast %130 : vector<1x4x128xf32> to vector<4x128xf32>
    %132 = vector.shape_cast %129 : vector<4x128xf32> to vector<1x4x128xf32>
    tpu.vector_store %arg6[%c0_85, %c0_86, %c0_87], %132 {strides = array<i32>} : memref<1x4x128xf32, #tpu.memory_space<vmem>>, vector<1x4x128xf32>,
    %c0_88 = arith.constant 0 : index
    %c0_89 = arith.constant 0 : index
    %c0_90 = arith.constant 0 : index
    %133 = vector.load %arg7[%c0_88, %c0_89, %c0_90] : memref<1x4x128xf32, #tpu.memory_space<vmem>>, vector<1x4x128xf32>
    %134 = vector.shape_cast %133 : vector<1x4x128xf32> to vector<4x128xf32>
    %135 = vector.broadcast %112 : vector<1x128xf32> to vector<4x128xf32>
    %136 = arith.mulf %135, %121 : vector<4x128xf32>
    %137 = vector.broadcast %115 : vector<1x128xf32> to vector<4x128xf32>
    %138 = arith.mulf %137, %118 : vector<4x128xf32>
    %139 = arith.addf %136, %138 : vector<4x128xf32>
    %140 = arith.addf %134, %139 : vector<4x128xf32>
    %c0_91 = arith.constant 0 : index
    %c0_92 = arith.constant 0 : index
    %c0_93 = arith.constant 0 : index
    %141 = vector.load %arg7[%c0_91, %c0_92, %c0_93] : memref<1x4x128xf32, #tpu.memory_space<vmem>>, vector<1x4x128xf32>
    %142 = vector.shape_cast %141 : vector<1x4x128xf32> to vector<4x128xf32>
    %143 = vector.shape_cast %140 : vector<4x128xf32> to vector<1x4x128xf32>
    tpu.vector_store %arg7[%c0_91, %c0_92, %c0_93], %143 {strides = array<i32>} : memref<1x4x128xf32, #tpu.memory_space<vmem>>, vector<1x4x128xf32>,
    %c4_i32 = arith.constant 4 : i32
    return
  }
  func.func @transform_0(%arg0: i32, %arg1: i32) -> (i32, i32, i32, i32) {
    %c0_i32 = arith.constant 0 : i32
    %c0_i32_0 = arith.constant 0 : i32
    %c0_i32_1 = arith.constant 0 : i32
    return %arg1, %c0_i32, %c0_i32_0, %arg0 : i32, i32, i32, i32
  }
  func.func @transform_1(%arg0: i32, %arg1: i32) -> (i32, i32, i32, i32) {
    %c0_i32 = arith.constant 0 : i32
    %c0_i32_0 = arith.constant 0 : i32
    %c0_i32_1 = arith.constant 0 : i32
    return %arg1, %c0_i32, %c0_i32_0, %arg0 : i32, i32, i32, i32
  }
  func.func @transform_2(%arg0: i32, %arg1: i32) -> (i32, i32, i32) {
    %c0_i32 = arith.constant 0 : i32
    %c0_i32_0 = arith.constant 0 : i32
    %c0_i32_1 = arith.constant 0 : i32
    return %c0_i32, %c0_i32_0, %arg0 : i32, i32, i32
  }
  func.func @transform_3(%arg0: i32, %arg1: i32) -> (i32, i32, i32) {
    %c0_i32 = arith.constant 0 : i32
    %c0_i32_0 = arith.constant 0 : i32
    %c0_i32_1 = arith.constant 0 : i32
    return %c0_i32, %c0_i32_0, %arg0 : i32, i32, i32
  }
  func.func @transform_4(%arg0: i32, %arg1: i32) -> (i32, i32, i32) {
    %c0_i32 = arith.constant 0 : i32
    %c0_i32_0 = arith.constant 0 : i32
    return %arg1, %c0_i32, %arg0 : i32, i32, i32
  }
  func.func @transform_5(%arg0: i32, %arg1: i32) -> (i32, i32, i32) {
    %c0_i32 = arith.constant 0 : i32
    %c0_i32_0 = arith.constant 0 : i32
    return %arg1, %c0_i32, %arg0 : i32, i32, i32
  }
}

</mosaic_0001>

<bundles_post_ra>
// kernel: tpu_custom_call.1
= control target key start
LH: loop header
LB: loop body
LE: loop exit
PB: predicated region body
PF: predicated region fallthrough
CT: control target
= control target key end

     0   :  { %s1476_s0 = inlined_call_operand.hbm [shape: f32[2,4,1,128], index: 0, kind: input, shape index: {}]   ;;  %s1477_s1 = inlined_call_operand.hbm [shape: f32[2,4,1,128], index: 1, kind: input, shape index: {}]   ;;  %s1478_s2 = inlined_call_operand.hbm [shape: f32[4,4,128], index: 2, kind: input, shape index: {}]   ;;  %s1479_s3 = inlined_call_operand.hbm [shape: f32[4,4,128], index: 3, kind: input, shape index: {}]   ;;  %s1480_s4 = inlined_call_operand.hbm [shape: f32[2,4,128], index: 4, kind: output, shape index: {0}]   ;;  %s1481_s5 = inlined_call_operand.hbm [shape: f32[2,4,128], index: 5, kind: output, shape index: {1}]  }
   0x1   :  { %1487 = sst [smem:[#allocation20_spill]] %s1476_s0 }
   0x2   :  { %1488 = sst [smem:[#allocation21_spill]] %s1478_s2 }
   0x3   :  { %1489 = sst [smem:[#allocation22_spill]] %s1479_s3 }
   0x4   :  { %11 = vsyncpa [#allocation3], 0 }
   0x5   :  { %13 = vsyncpa [#allocation3 + $0x1], 0 }
   0x6   :  { %14 = vsyncpa [#allocation6], 0 }
   0x7   :  { %16 = vsyncpa [#allocation6 + $0x1], 0 }
   0x8   :  { %17 = vsyncpa [#allocation9], 0 }
   0x9   :  { %18 = vsyncpa [#allocation4], 0 }
   0xa   :  { %20 = vsyncpa [#allocation4 + $0x1], 0 }
   0xb   :  { %21 = vsyncpa [#allocation12], 0 }
   0xc   :  { %23 = vsyncpa [#allocation12 + $0x1], 0  ;;  %s1105_s18 = smov 0   ;;  %s1107_s19 = smov 0  }
   0xd   :  { %s1109_s20 = smov 0   ;;  %s1111_s21 = smov 0  }
   0xe   :  { %s1113_s22 = smov 0   ;;  %s1115_s23 = smov 0  }
   0xf LB: > { %s1136_s24 = sadd.s32 4294967295, %s1062_s23   ;;  %s682_s25 = sadd.s32 4294967294, %s1062_s23   ;;  %s1062_s23 = sphi %s1115_s23, %s29_s23   ;;  %s1058_s22 = sphi %s1113_s22, %s1515_s22   ;;  %s1054_s21 = sphi %s1111_s21, %s1514_s21   ;;  %s1050_s20 = sphi %s1109_s20, %s1513_s20   ;;  %s1046_s19 = sphi %s1107_s19, %s1512_s19   ;;  %s1042_s18 = sphi %s1105_s18, %s1511_s18  }
  0x10   : > { %p63_p0 = scmp.ne.s32.totalorder %s1046_s19, %s1042_s18  ;;  %p1482_p1 = scmp.eq.s32.totalorder %s1136_s24, 0 }
  0x11   : > { %p175_p3 = scmp.eq.s32.totalorder %s682_s25, 1  ;;  %p683_p5 = scmp.ge.s32.totalorder %s1062_s23, 1 }
  0x12   : > { %p1145_p4 = por %p1482_p1, %p63_p0  ;;  %p210_p7 = scmp.lt.s32.totalorder %s1062_s23, 3 }
  0x13   : > { %p1150_p6 = por %p175_p3, %p63_p0  ;;  %s1064_s29 = smov [#allocation7]  }
  0x14   : > { %s1490_s26 = scalar_select %p1145_p4, 1, 0 }
  0x15   : > { %s1491_s27 = scalar_select %p1150_p6, 1, 0 }
  0x16   : > { %p1155_p8 = pnand %p683_p5, %p210_p7  ;;  %s224_s30 = sshll.u32 %s1064_s29, 4  ;;  %s1159_s30 = int_to_ptr.vmem [resolvable:$true] %s224_s30 }
  0x17   : > { %s1065_s7 = smov [#allocation8]   ;;  %s1494_s2 = sld [smem:[#allocation21_spill]] }
  0x18   : > { %p738_p9 = pneg %p1155_p8  ;;  %s239_s8 = sshll.u32 %s1065_s7, 4  ;;  %s1170_s8 = int_to_ptr.vmem [resolvable:$true] %s239_s8 }
  0x1a   : > { %p1166_p11 = pnand %p738_p9, %p1482_p1 }
  0x1c   : > { %p822_p13 = pneg %p1166_p11 }
  0x1d   : > { %s820_s11 = scalar_lea.hbm %s1494_s2, 256 }
  0x1e   : > { %p821_p12 = scmp.ne.s32.totalorder %s1494_s2, %s820_s11  ;;  %p827_p5 = scmp.lt.u32.totalorder %s820_s11, %s1494_s2 }
  0x20   : > { %p823_p0 = pnand %p822_p13, %p821_p12 }
  0x22   : > { %p824_p3 = pneg %p823_p0 }
  0x24   : > { %p829_p7 = pnand %p827_p5, %p824_p3 }
  0x26   : > { %832 = shalt.err (!%p829_p7)
}
  0x27   : > { %s833_s16 = scalar_lea.vmem %s1159_s30, 256  ;;  %p841_p2 = scmp.lt.s32.totalorder %s1159_s30, %s1159_s30 }
  0x28   : > { %p834_p9 = scmp.ne.s32.totalorder %s1159_s30, %s833_s16  ;;  %p842_p12 = scmp.lt.s32.totalorder %s833_s16, %s833_s16 }
  0x2a   : > { %p836_p10 = pnand %p834_p9, %p822_p13  ;;  %p843_p0 = por %p842_p12, %p841_p2 }
  0x2c   : > { %p837_p1 = pneg %p836_p10 }
  0x2e   : > { %p844_p6 = pnand %p843_p0, %p837_p1 }
  0x30   : > { %847 = shalt.err (!%p844_p6)
}
  0x31   : > { %s1066_s17 = smov 64   ;;  %s1067_s25 = smov 4  }
  0x32   : > { %741 = dma.hbm_to_vmem [thread:$0]  (!%p1166_p11), %s1494_s2, 256, %s1159_s30, [#allocation6], %s1066_s17, %s1066_s17, %s1067_s25  }
  0x33   : > { %s1495_s3 = sld [smem:[#allocation22_spill]] }
  0x39   : > { %s848_s11 = scalar_lea.hbm %s1495_s3, 256 }
  0x3a   : > { %p849_p2 = scmp.ne.s32.totalorder %s1495_s3, %s848_s11  ;;  %p855_p10 = scmp.lt.u32.totalorder %s848_s11, %s1495_s3 }
  0x3c   : > { %p851_p1 = pnand %p849_p2, %p822_p13 }
  0x3e   : > { %p852_p6 = pneg %p851_p1 }
  0x40   : > { %p857_p3 = pnand %p855_p10, %p852_p6 }
  0x42   : > { %860 = shalt.err (!%p857_p3)
}
  0x43   : > { %s861_s30 = scalar_lea.vmem %s1170_s8, 256  ;;  %p869_p12 = scmp.lt.s32.totalorder %s1170_s8, %s1170_s8 }
  0x44   : > { %p862_p5 = scmp.ne.s32.totalorder %s1170_s8, %s861_s30  ;;  %p870_p0 = scmp.lt.s32.totalorder %s861_s30, %s861_s30 }
  0x46   : > { %p864_p7 = pnand %p862_p5, %p822_p13  ;;  %p871_p2 = por %p870_p0, %p869_p12 }
  0x48   : > { %p865_p9 = pneg %p864_p7 }
  0x4a   : > { %p872_p1 = pnand %p871_p2, %p865_p9 }
  0x4c   : > { %875 = shalt.err (!%p872_p1)
}
  0x4d   : > { %744 = dma.hbm_to_vmem [thread:$0]  (!%p1166_p11), %s1495_s3, 256, %s1170_s8, [#allocation9], %s1066_s17, %s1066_s17, %s1067_s25  }
  0x4e   : > { %s38_s7 = sadd.s32 1, %s1058_s22  ;;  %s50_s9 = sadd.s32 1, %s1050_s20 }
  0x4f   : > { %p39_p13 = scmp.ge.s32.totalorder %s38_s7, 2  ;;  %p57_p6 = scmp.ne.s32.totalorder %s1050_s20, %s1046_s19 }
  0x50   : > { %p58_p10 = scmp.eq.s32.totalorder %s1062_s23, 0  ;;  %p761_p3 = scmp.lt.s32.totalorder %s1062_s23, 2 }
  0x51   : > { %s1517_s7 = smov (%p39_p13, %s38_s7), 0  ;;  %p1497_p7 = scmp.eq.s32.totalorder %s1136_s24, 1 }
  0x52   : > { %1496 = sst [smem:[#allocation19_spill]] %s1517_s7  ;;  %p59_p5 = por %p58_p10, %p57_p6 }
  0x53   : > { %p1234_p9 = por %p1497_p7, %p57_p6  ;;  %s45_s10 = ssub.s32 %s1058_s22, %s1517_s7 }
  0x54   : > { %s253_s11 = sand.u32 1, %s1050_s20   ;;  %p48_p11 = scmp.eq.s32.totalorder %s45_s10, 0 }
  0x55   : > { %s1498_s6 = scalar_select %p1234_p9, 1, 0 }
  0x56   : > { %s1241_s8 = sshll.u32 %s253_s11, 2  ;;  %s1483_s17 = sshll.u32 %s1058_s22, 6 }
  0x57   : > { %s1245_s25 = scalar_select %p48_p11, %s1050_s20, %s50_s9  }
  0x58   : > { %s1499_s0 = sld [smem:[#allocation20_spill]]  ;;  %s257_s15 = scalar_lea.vmem [#allocation2], %s1241_s8 }
  0x59   : > { %s265_s30 = sshll.u32 %s257_s15, 4  ;;  %p1257_p12 = pnand %p761_p3, %p59_p5  ;;  %s1261_s30 = int_to_ptr.vmem [resolvable:$true] %s265_s30 }
  0x5a   : > { %s1263_s29 = scalar_lea.sflag [#allocation3], %s253_s11 }
  0x5b   : > { %p878_p2 = pneg %p1257_p12 }
  0x5e   : > { %s1252_s14 = scalar_lea.hbm %s1499_s0, %s1483_s17  ;;  %s881_s13 = scalar_lea.hbm %s1499_s0, 128 }
  0x5f   : > { %s876_s9 = scalar_lea.hbm %s1252_s14, 64  ;;  %p882_p6 = scmp.lt.u32.totalorder %s1252_s14, %s1499_s0 }
  0x60   : > { %p877_p0 = scmp.ne.s32.totalorder %s1252_s14, %s876_s9  ;;  %p883_p10 = scmp.lt.u32.totalorder %s881_s13, %s876_s9 }
  0x61   : > { %p885_p5 = scmp.lt.u32.totalorder %s876_s9, %s1252_s14 }
  0x62   : > { %p879_p1 = pnand %p878_p2, %p877_p0  ;;  %p884_p3 = por %p883_p10, %p882_p6 }
  0x64   : > { %p880_p13 = pneg %p879_p1  ;;  %p886_p7 = por %p885_p5, %p884_p3 }
  0x66   : > { %p887_p11 = pnand %p886_p7, %p880_p13 }
  0x68   : > { %890 = shalt.err (!%p887_p11)
}
  0x69   : > { %s891_s11 = scalar_lea.vmem %s1261_s30, 64  ;;  %s1068_s10 = smov [#allocation2]  }
  0x6a   : > { %p892_p0 = scmp.ne.s32.totalorder %s1261_s30, %s891_s11  ;;  %s896_s12 = sshll.u32 %s1068_s10, 4  ;;  %s897_s12 = int_to_ptr.vmem [resolvable:$false] %s896_s12 }
  0x6b   : > { %s898_s17 = scalar_lea.vmem %s897_s12, 128  ;;  %p899_p4 = scmp.lt.s32.totalorder %s1261_s30, %s897_s12 }
  0x6c   : > { %p894_p1 = pnand %p892_p0, %p878_p2  ;;  %p900_p6 = scmp.lt.s32.totalorder %s898_s17, %s891_s11 }
  0x6e   : > { %p895_p9 = pneg %p894_p1  ;;  %p901_p10 = por %p900_p6, %p899_p4 }
  0x70   : > { %p902_p3 = pnand %p901_p10, %p895_p9 }
  0x72   : > { %905 = shalt.err (!%p902_p3)
}
  0x73   : > { %s1069_s9 = smov 16   ;;  %s1070_s13 = smov 1  }
  0x74   : > { %748 = dma.hbm_to_vmem [thread:$0]  (!%p1257_p12), %s1252_s14, 64, %s1261_s30, %s1263_s29, %s1069_s9, %s1069_s9, %s1070_s13  }
  0x75   : > { %s1501_s15 = sshll.u32 %s1058_s22, 6  ;;  %s279_s17 = scalar_lea.vmem [#allocation5], %s1241_s8 }
  0x76   : > { %s1299_s12 = scalar_lea.hbm %s1477_s1, %s1501_s15  ;;  %s287_s0 = sshll.u32 %s279_s17, 4  ;;  %s1303_s0 = int_to_ptr.vmem [resolvable:$true] %s287_s0 }
  0x77   : > { %s275_s2 = sand.u32 1, %s1062_s23   ;;  %s906_s7 = scalar_lea.hbm %s1299_s12, 64 }
  0x78   : > { %s1305_s3 = scalar_lea.sflag [#allocation6], %s275_s2  ;;  %p907_p4 = scmp.ne.s32.totalorder %s1299_s12, %s906_s7 }
  0x79   : > { %s911_s29 = scalar_lea.hbm %s1477_s1, 128  ;;  %p912_p5 = scmp.lt.u32.totalorder %s1299_s12, %s1477_s1 }
  0x7a   : > { %p909_p9 = pnand %p907_p4, %p878_p2  ;;  %p913_p7 = scmp.lt.u32.totalorder %s911_s29, %s906_s7 }
  0x7b   : > { %p915_p0 = scmp.lt.u32.totalorder %s906_s7, %s1299_s12 }
  0x7c   : > { %p910_p13 = pneg %p909_p9  ;;  %p914_p11 = por %p913_p7, %p912_p5 }
  0x7e   : > { %p916_p1 = por %p915_p0, %p914_p11 }
  0x80   : > { %p917_p6 = pnand %p916_p1, %p910_p13 }
  0x82   : > { %920 = shalt.err (!%p917_p6)
}
  0x83   : > { %s921_s2 = scalar_lea.vmem %s1303_s0, 64  ;;  %s1071_s8 = smov [#allocation5]  }
  0x84   : > { %p922_p10 = scmp.ne.s32.totalorder %s1303_s0, %s921_s2  ;;  %s926_s10 = sshll.u32 %s1071_s8, 4  ;;  %s927_s10 = int_to_ptr.vmem [resolvable:$false] %s926_s10 }
  0x85   : > { %s928_s17 = scalar_lea.vmem %s927_s10, 128  ;;  %p929_p9 = scmp.lt.s32.totalorder %s1303_s0, %s927_s10 }
  0x86   : > { %p924_p3 = pnand %p922_p10, %p878_p2  ;;  %p930_p5 = scmp.lt.s32.totalorder %s928_s17, %s921_s2 }
  0x88   : > { %p925_p4 = pneg %p924_p3  ;;  %p931_p7 = por %p930_p5, %p929_p9 }
  0x8a   : > { %p932_p11 = pnand %p931_p7, %p925_p4 }
  0x8c   : > { %935 = shalt.err (!%p932_p11)
}
  0x8d   : > { %751 = dma.hbm_to_vmem [thread:$0]  (!%p1257_p12), %s1299_s12, 64, %s1303_s0, %s1305_s3, %s1069_s9, %s1069_s9, %s1070_s13  }
  0x8e   : > { %299 = sbr.rel (%p1155_p8) target bundleno = 238 (0xee), region = 36  ;;  %s1337_s7 = sand.u32 (!%p1155_p8), 1, %s1046_s19  }
  0x8f   : > { %s694_s14 = sshll.u32 (!%p1155_p8), %s1337_s7, 2  ;;  %s302_s30 = scalar_lea.sflag (!%p1155_p8), [#allocation3], %s1337_s7 }
  0x90   : > { %s1341_s29 = scalar_lea.vmem (!%p1155_p8), [#allocation2], %s694_s14  ;;  %p1502_p2 = scmp.ne.s32.totalorder (!%p1155_p8), %s1490_s26, 0 }
  0x95   : > { %1017 = dma.done.wait (%p1502_p2), %s302_s30, 64  }
  0x96   : > { %1019 = vsyncadd (%p1502_p2), %s302_s30, 4294967232  ;;  %s310_s0 = sand.u32 1, %s1136_s24   ;;  %s1348_s28 = scalar_lea.vmem [#allocation5], %s694_s14 }
  0x97   : > { %s311_s3 = scalar_lea.sflag [#allocation6], %s310_s0 }
  0x98   : > { %1021 = dma.done.wait (%p1502_p2), %s311_s3, 64  }
  0x99   : > { %1023 = vsyncadd (%p1502_p2), %s311_s3, 4294967232  ;;  %p1503_p8 = scmp.eq.s32.totalorder %s1136_s24, 0 }
  0x9b   : > { %1025 = dma.done.wait (%p1503_p8), [#allocation6], 256   ;;  %p1504_p12 = pmov %p1503_p8 }
  0x9c   : > { %p1505_p13 = pmov %p1503_p8 }
  0x9d   : > { %1027 = vsyncadd (%p1504_p12), [#allocation6], 4294967040 }
  0x9e   : > { %1029 = dma.done.wait (%p1505_p13), [#allocation9], 256   ;;  %p1506_p0 = pmov %p1503_p8 }
  0x9f   : > { %s1362_s16 = scalar_lea.vmem [#allocation10], %s694_s14  ;;  %v1072_v0 = vmov 0.0   ;;  %s1365_s26 = scalar_lea.vmem [#allocation11], %s694_s14  ;;  %v700_v1 = vld [vmem:[%s1341_s29] ss:$0 sm:$0xff] }
  0xa0   : > { %1031 = vsyncadd (%p1506_p0), [#allocation9], 4294967040  ;;  %359 = vst [vmem:[%s1362_s16] sm:$0xf] %v1072_v0  ;;  %v701_v2 = vld [vmem:[%s1348_s28] ss:$0 sm:$0xff]  ;;  %s716_s24 = sshll.u32 %s1054_s21, 6 }
  0xa1   : > { %360 = vst [vmem:[%s1365_s26] sm:$0xf] %v1072_v0  ;;  %v363_v3 = vld [vmem:[#allocation7] sm:$0xf]  ;;  %v364_v4 = vld [vmem:[#allocation8] sm:$0xf]  ;;  %s505_s9 = sshll.u32 %s1362_s16, 4  ;;  %s1396_s11 = scalar_lea.hbm %s1480_s4, %s716_s24  ;;  %s1398_s9 = int_to_ptr.vmem [resolvable:$true] %s505_s9 }
  0xa2   : > { %v372_v5 = vmul.f32 %v700_v1, %v363_v3  ;;  %v385_v6 = vmul.f32 %v701_v2, %v363_v3  ;;  %v379_v7 = vmul.f32 %v701_v2, %v364_v4  ;;  %v384_v8 = vmul.f32 %v700_v1, %v364_v4  ;;  %v704_v13 = vld [vmem:[%s1341_s29 + $0x1] ss:$0 sm:$0xff]  ;;  %v705_v14 = vld [vmem:[%s1348_s28 + $0x1] ss:$0 sm:$0xff]  ;;  %v394_v15 = vld [vmem:[#allocation7 + $0x4] sm:$0xf]  ;;  %s1403_s21 = scalar_lea.hbm %s1481_s5, %s716_s24 }
  0xa3   : > { %v396_v16 = vld [vmem:[#allocation8 + $0x4] sm:$0xf]  ;;  %v404_v19 = vmul.f32 %v704_v13, %v394_v15  ;;  %v417_v22 = vmul.f32 %v705_v14, %v394_v15  ;;  %v709_v26 = vld [vmem:[%s1348_s28 + $0x2] ss:$0 sm:$0xff]  ;;  %v426_v27 = vld [vmem:[#allocation7 + $0x8] sm:$0xf] }
  0xa4   : > { %v380_v11 = vsub.f32 %v372_v5, %v379_v7  ;;  %v386_v12 = vadd.f32 %v385_v6, %v384_v8  ;;  %v411_v20 = vmul.f32 %v705_v14, %v396_v16  ;;  %v416_v21 = vmul.f32 %v704_v13, %v396_v16  ;;  %v708_v25 = vld [vmem:[%s1341_s29 + $0x2] ss:$0 sm:$0xff]  ;;  %v428_v30 = vld [vmem:[#allocation8 + $0x8] sm:$0xf]  ;;  %v712_v39 = vld [vmem:[%s1341_s29 + $0x3] ss:$0 sm:$0xff] }
  0xa5   : > { %v436_v33 = vmul.f32 %v708_v25, %v426_v27  ;;  %v443_v34 = vmul.f32 %v709_v26, %v428_v30  ;;  %v448_v35 = vmul.f32 %v708_v25, %v428_v30  ;;  %v449_v36 = vmul.f32 %v709_v26, %v426_v27  ;;  %v713_v40 = vld [vmem:[%s1348_s28 + $0x3] ss:$0 sm:$0xff]  ;;  %v458_v41 = vld [vmem:[#allocation7 + $0xc] sm:$0xf]  ;;  %s519_s13 = sshll.u32 %s1365_s26, 4  ;;  %s486_s10 = scalar_lea.sflag [#allocation4], %s1337_s7  ;;  %s1405_s13 = int_to_ptr.vmem [resolvable:$true] %s519_s13 }
  0xa6   : > { %v412_v23 = vsub.f32 %v404_v19, %v411_v20  ;;  %v418_v24 = vadd.f32 %v417_v22, %v416_v21  ;;  %v460_v44 = vld [vmem:[#allocation8 + $0xc] sm:$0xf]  ;;  %v468_v47 = vmul.f32 %v712_v39, %v458_v41  ;;  %v481_v50 = vmul.f32 %v713_v40, %v458_v41  ;;  %s936_s17 = scalar_lea.vmem %s1398_s9, 64  ;;  %p1507_p6 = scmp.ne.s32.totalorder %s1498_s6, 0 }
  0xa7   : > { %v365_v9 = vld [vmem:[%s1362_s16] sm:$0xf]  ;;  %v444_v37 = vsub.f32 %v436_v33, %v443_v34  ;;  %v450_v38 = vadd.f32 %v449_v36, %v448_v35  ;;  %v475_v48 = vmul.f32 %v713_v40, %v460_v44  ;;  %v480_v49 = vmul.f32 %v712_v39, %v460_v44  ;;  %p937_p1 = scmp.ne.s32.totalorder %s1398_s9, %s936_s17  ;;  %s1073_s14 = smov [#allocation10]  }
  0xa8   : > { %v383_v10 = vld [vmem:[%s1365_s26] sm:$0xf]  ;;  %v381_v17 = vadd.f32 %v380_v11, %v365_v9  ;;  %s940_s30 = sshll.u32 %s1073_s14, 4  ;;  %s941_s30 = int_to_ptr.vmem [resolvable:$false] %s940_s30 }
  0xa9   : > { %v387_v18 = vadd.f32 %v386_v12, %v383_v10  ;;  %v476_v51 = vsub.f32 %v468_v47, %v475_v48  ;;  %v482_v52 = vadd.f32 %v481_v50, %v480_v49  ;;  %p938_p10 = pnand %p937_p1, %p1507_p6  ;;  %s942_s29 = scalar_lea.vmem %s941_s30, 128 }
  0xaa   : > { %382 = vst [vmem:[%s1362_s16] sm:$0xf] %v381_v17  ;;  %p943_p4 = scmp.lt.s32.totalorder %s1398_s9, %s941_s30  ;;  %p944_p9 = scmp.lt.s32.totalorder %s942_s29, %s936_s17 }
  0xab   : > { %388 = vst [vmem:[%s1365_s26] sm:$0xf] %v387_v18  ;;  %p939_p3 = pneg %p938_p10 }
  0xac   : > { %p945_p5 = por %p944_p9, %p943_p4 }
  0xae   : > { %p946_p7 = pnand %p945_p5, %p939_p3 }
  0xb1   : > { %v397_v28 = vld [vmem:[%s1362_s16] sm:$0xf] }
  0xb2   : > { %v415_v29 = vld [vmem:[%s1365_s26] sm:$0xf]  ;;  %v413_v31 = vadd.f32 %v412_v23, %v397_v28 }
  0xb3   : > { %v419_v32 = vadd.f32 %v418_v24, %v415_v29 }
  0xb4   : > { %414 = vst [vmem:[%s1362_s16] sm:$0xf] %v413_v31 }
  0xb5   : > { %420 = vst [vmem:[%s1365_s26] sm:$0xf] %v419_v32 }
  0xbb   : > { %v429_v42 = vld [vmem:[%s1362_s16] sm:$0xf] }
  0xbc   : > { %v447_v43 = vld [vmem:[%s1365_s26] sm:$0xf]  ;;  %v445_v45 = vadd.f32 %v444_v37, %v429_v42 }
  0xbd   : > { %v451_v46 = vadd.f32 %v450_v38, %v447_v43 }
  0xbe   : > { %446 = vst [vmem:[%s1362_s16] sm:$0xf] %v445_v45 }
  0xbf   : > { %452 = vst [vmem:[%s1365_s26] sm:$0xf] %v451_v46 }
  0xc5   : > { %v461_v53 = vld [vmem:[%s1362_s16] sm:$0xf] }
  0xc6   : > { %v479_v54 = vld [vmem:[%s1365_s26] sm:$0xf]  ;;  %v477_v55 = vadd.f32 %v476_v51, %v461_v53 }
  0xc7   : > { %v483_v56 = vadd.f32 %v482_v52, %v479_v54 }
  0xc8   : > { %478 = vst [vmem:[%s1362_s16] sm:$0xf] %v477_v55 }
  0xc9   : > { %484 = vst [vmem:[%s1365_s26] sm:$0xf] %v483_v56 }
  0xca   : > { %949 = shalt.err (!%p946_p7)
}
  0xcb   : > { %s950_s0 = scalar_lea.hbm %s1396_s11, 64  ;;  %s954_s16 = scalar_lea.hbm %s1480_s4, 128 }
  0xcc   : > { %p951_p11 = scmp.ne.s32.totalorder %s1396_s11, %s950_s0  ;;  %p955_p12 = scmp.lt.u32.totalorder %s1396_s11, %s1480_s4 }
  0xcd   : > { %p956_p13 = scmp.lt.u32.totalorder %s954_s16, %s950_s0  ;;  %p958_p1 = scmp.lt.u32.totalorder %s950_s0, %s1396_s11 }
  0xce   : > { %p952_p2 = pnand %p951_p11, %p1507_p6 }
  0xcf   : > { %p957_p0 = por %p956_p13, %p955_p12 }
  0xd0   : > { %p953_p8 = pneg %p952_p2 }
  0xd1   : > { %p959_p10 = por %p958_p1, %p957_p0 }
  0xd3   : > { %p960_p3 = pnand %p959_p10, %p953_p8 }
  0xd5   : > { %963 = shalt.err (!%p960_p3)
}
  0xd6   : > { %734 = dma.vmem_to_hbm [thread:$0]  (%p1507_p6), %s1398_s9, 64, %s1396_s11, %s486_s10  }
  0xd7   : > { %s491_s12 = scalar_lea.sflag [#allocation12], %s1337_s7  ;;  %s964_s15 = scalar_lea.vmem %s1405_s13, 64 }
  0xd8   : > { %p965_p4 = scmp.ne.s32.totalorder %s1405_s13, %s964_s15  ;;  %s1074_s2 = smov [#allocation11]  }
  0xd9   : > { %s968_s8 = sshll.u32 %s1074_s2, 4  ;;  %s969_s8 = int_to_ptr.vmem [resolvable:$false] %s968_s8 }
  0xda   : > { %p966_p9 = pnand %p965_p4, %p1507_p6  ;;  %s970_s17 = scalar_lea.vmem %s969_s8, 128 }
  0xdb   : > { %p971_p7 = scmp.lt.s32.totalorder %s1405_s13, %s969_s8  ;;  %p972_p11 = scmp.lt.s32.totalorder %s970_s17, %s964_s15 }
  0xdc   : > { %p967_p5 = pneg %p966_p9 }
  0xdd   : > { %p973_p2 = por %p972_p11, %p971_p7 }
  0xdf   : > { %p974_p8 = pnand %p973_p2, %p967_p5 }
  0xe1   : > { %977 = shalt.err (!%p974_p8)
}
  0xe2   : > { %s978_s7 = scalar_lea.hbm %s1403_s21, 64  ;;  %s982_s10 = scalar_lea.hbm %s1481_s5, 128 }
  0xe3   : > { %p979_p12 = scmp.ne.s32.totalorder %s1403_s21, %s978_s7  ;;  %p983_p1 = scmp.lt.u32.totalorder %s1403_s21, %s1481_s5 }
  0xe4   : > { %p984_p10 = scmp.lt.u32.totalorder %s982_s10, %s978_s7  ;;  %p986_p4 = scmp.lt.u32.totalorder %s978_s7, %s1403_s21 }
  0xe5   : > { %p980_p13 = pnand %p979_p12, %p1507_p6 }
  0xe6   : > { %p985_p3 = por %p984_p10, %p983_p1 }
  0xe7   : > { %p981_p0 = pneg %p980_p13 }
  0xe8   : > { %p987_p9 = por %p986_p4, %p985_p3 }
  0xea   : > { %p988_p5 = pnand %p987_p9, %p981_p0 }
  0xec   : > { %991 = shalt.err (!%p988_p5)
}
  0xed   : > { %735 = dma.vmem_to_hbm [thread:$0]  (%p1507_p6), %s1405_s13, 64, %s1403_s21, %s491_s12  }
  0xee PF: > { %s531_s29 = sand.u32 1, %s1042_s18   ;;  %p1508_p7 = scmp.ne.s32.totalorder %s1491_s27, 0 }
  0xef   : > { %p1509_p11 = scmp.ge.s32.totalorder %s1062_s23, 2  ;;  %s532_s0 = scalar_lea.sflag [#allocation4], %s531_s29 }
  0xf1   : > { %p753_p2 = pnand %p1509_p11, %p1508_p7 }
  0xf3   : > { %1033 = dma.done.wait (!%p753_p2), %s532_s0, 64  }
  0xf4   : > { %1035 = vsyncadd (!%p753_p2), %s532_s0, 4294967232  ;;  %s541_s3 = scalar_lea.sflag [#allocation12], %s531_s29 }
  0xf5   : > { %1037 = dma.done.wait (!%p753_p2), %s541_s3, 64  }
  0xf6   : > { %1039 = vsyncadd (!%p753_p2), %s541_s3, 4294967232  ;;  %s29_s23 = sadd.s32 1, %s1062_s23   ;;  %s1510_s6 = sld [smem:[#allocation19_spill]] }
  0xf7   : > { %p26_p8 = scmp.ge.s32.totalorder %s29_s23, 4   ;;  %s1511_s18 = smov %s1046_s19 }
  0xf8   : > { %s1512_s19 = smov %s1050_s20  ;;  %s1513_s20 = smov %s1245_s25 }
  0xf9   : > { %s1514_s21 = smov %s1058_s22  ;;  %28 = sbr.rel (!%p26_p8) target bundleno = 15 (0xf), region = 133 }
  0xfc   : > { %s1515_s22 = smov %s1510_s6 }
 0x100   :  { %546 = vsyncpa [#allocation3], 1 }
 0x101   :  { %548 = vsyncpa [#allocation3 + $0x1], 1 }
 0x102   :  { %549 = vsyncpa [#allocation6], 1 }
 0x103   :  { %551 = vsyncpa [#allocation6 + $0x1], 1 }
 0x104   :  { %552 = vsyncpa [#allocation9], 1 }
 0x105   :  { %553 = vsyncpa [#allocation4], 1 }
 0x106   :  { %555 = vsyncpa [#allocation4 + $0x1], 1 }
 0x107   :  { %556 = vsyncpa [#allocation12], 1 }
 0x108   :  { %558 = vsyncpa [#allocation12 + $0x1], 1 }

</bundles_post_ra>
